<compile_context>
chip_gen: v7x
topology: tpu7x:2x2x1
jax: 0.10.0
libtpu: 0.0.40
codegen_flags: <defaults>
</compile_context>

<pallas_src>
import jax
import jax.numpy as jnp
from jax.experimental import pallas as pl
from jax.experimental.pallas import tpu as pltpu

EPS = 1e-5


def _pick_batch_tile(B, C, HW, max_bt):
    """Largest divisor Bt of B with a ~4 MiB per-array block and >=2 grid steps (when B>=2)."""
    c_pad = max(8, -(-C // 8) * 8)
    hw_pad = max(128, -(-HW // 128) * 128)
    per_b = c_pad * hw_pad * 4                 # VMEM bytes of one batch of one array
    budget = 4 << 20                           # ~4 MiB per array block (x3 arrays, x2 buffers)
    best = 1
    for bt in range(1, B + 1):
        if B % bt:
            continue
        if bt > max_bt:
            continue
        if B >= 2 and (B // bt) < 2:           # keep >= 2 grid steps for megacore / v7x 2-TC
            continue
        if bt * per_b <= budget:
            best = bt
    return best


def _make_kernel_small_c(Bt, C, HW):
    """VPU path for tiny C: weights as SMEM scalars, conv+ReLU+pool fused per output channel."""
    inv_hw = 1.0 / float(HW)

    def kernel(base_ref, refx_ref, wr_s, br_s, wg_s, bg_s, wb_s, bb_s, out_ref):
        for b in range(Bt):
            # ---- InstanceNorm2d (no affine), biased variance, eps=1e-5 ----
            xb = base_ref[b]                                         # (C, HW) f32
            mean = jnp.sum(xb, axis=-1, keepdims=True) * inv_hw
            cen = xb - mean
            var = jnp.sum(cen * cen, axis=-1, keepdims=True) * inv_hw
            bn = cen * jax.lax.rsqrt(var + EPS)

            # ---- conv_ref (1x1) + ReLU + AdaptiveAvgPool, per output channel ----
            rb = refx_ref[b]                                         # (C, HW) f32
            rows = [rb[c:c + 1, :] for c in range(C)]                # C x (1, HW)
            pooled = []
            for o in range(C):
                v = rows[0] * wr_s[o, 0]
                for c in range(1, C):
                    v = v + rows[c] * wr_s[o, c]
                v = jnp.maximum(v + br_s[o, 0], 0.0)
                pooled.append(jnp.sum(v, axis=-1, keepdims=True) * inv_hw)   # (1, 1)

            # ---- conv_gamma / conv_beta on the pooled vector (scalar math) ----
            gammas, betas = [], []
            for o in range(C):
                g = pooled[0] * wg_s[o, 0]
                be = pooled[0] * wb_s[o, 0]
                for c in range(1, C):
                    g = g + pooled[c] * wg_s[o, c]
                    be = be + pooled[c] * wb_s[o, c]
                gammas.append(g + (bg_s[o, 0] + 1.0))
                betas.append(be + bb_s[o, 0])
            gamma_col = jnp.concatenate(gammas, axis=0)              # (C, 1)
            beta_col = jnp.concatenate(betas, axis=0)                # (C, 1)

            # ---- AdaIN combine ----
            out_ref[b] = bn * gamma_col + beta_col

    return kernel


def _make_kernel_mxu(Bt, C, HW):
    """MXU path for larger C: per-batch (C,C)x(C,HW) bf16 dot; pooled/gamma/beta stay f32."""
    inv_hw = 1.0 / float(HW)

    def kernel(base_ref, refx_ref, wr_ref, br_ref, wg_ref, bg_ref, wb_ref, bb_ref, out_ref):
        w_conv = wr_ref[...]            # (C, C) bf16 (pre-cast in wrapper)
        b_conv = br_ref[...]            # (C, 1) f32
        w_gamma = wg_ref[...]           # (C, C) f32
        b_gamma = bg_ref[...]           # (C, 1) f32
        w_beta = wb_ref[...]            # (C, C) f32
        b_beta = bb_ref[...]            # (C, 1) f32
        for b in range(Bt):
            xb = base_ref[b]                                         # (C, HW) f32
            mean = jnp.sum(xb, axis=-1, keepdims=True) * inv_hw
            cen = xb - mean
            var = jnp.sum(cen * cen, axis=-1, keepdims=True) * inv_hw
            bn = cen * jax.lax.rsqrt(var + EPS)

            rb = refx_ref[b].astype(jnp.bfloat16)                    # (C, HW)
            r = jnp.dot(w_conv, rb, preferred_element_type=jnp.float32)
            r = jnp.maximum(r + b_conv, 0.0)
            pooled = jnp.sum(r, axis=-1, keepdims=True) * inv_hw     # (C, 1) f32

            gamma = jnp.dot(w_gamma, pooled, preferred_element_type=jnp.float32) + b_gamma
            beta = jnp.dot(w_beta, pooled, preferred_element_type=jnp.float32) + b_beta
            out_ref[b] = bn * (gamma + 1.0) + beta

    return kernel


def adain_pallas(base, ref, params):
    """base, ref: (B, C, H, W) float32. Returns (B, C, H, W) float32."""
    B, C, H, W = base.shape
    HW = H * W
    w_ref, b_ref, w_g, b_g, w_b, b_b = params    # (C,C) weights, (C,1) biases

    # Free reshapes (no pad / no post-slice): the kernel is the only pass over the data.
    base3 = base.reshape(B, C, HW).astype(jnp.float32)
    ref3 = ref.reshape(B, C, HW).astype(jnp.float32)

    use_vpu = C <= 8
    max_bt = max(1, min(32, 512 // max(1, C * C))) if use_vpu else 32
    Bt = _pick_batch_tile(B, C, HW, max_bt)
    grid = (B // Bt,)

    c_pad = max(8, -(-C // 8) * 8)
    hw_pad = max(128, -(-HW // 128) * 128)
    per_b = c_pad * hw_pad * 4
    block_bytes = Bt * per_b

    # Block dims C and HW equal the full array dims -> always layout-legal, any Bt.
    data_spec = pl.BlockSpec((Bt, C, HW), lambda i: (i, 0, 0))

    if use_vpu:
        kernel = _make_kernel_small_c(Bt, C, HW)
        smem_spec = pl.BlockSpec(memory_space=pltpu.MemorySpace.SMEM)
        in_specs = [data_spec, data_spec] + [smem_spec] * 6
        operands = (base3, ref3, w_ref, b_ref, w_g, b_g, w_b, b_b)
        weight_bytes = 4 * (3 * C * C + 3 * C)
    else:
        kernel = _make_kernel_mxu(Bt, C, HW)
        wspec = pl.BlockSpec((C, C), lambda i: (0, 0))
        bspec = pl.BlockSpec((C, 1), lambda i: (0, 0))
        in_specs = [data_spec, data_spec, wspec, bspec, wspec, bspec, wspec, bspec]
        operands = (base3, ref3, w_ref.astype(jnp.bfloat16), b_ref, w_g, b_g, w_b, b_b)
        weight_bytes = 2 * C * C + 4 * (2 * C * C + 3 * C)

    # 3 arrays double-buffered + per-batch intermediates + (tiny) weights + margin,
    # capped at 48 MiB so there is headroom on v7x's 64 MiB VMEM.
    needed = 6 * block_bytes + 4 * per_b + 2 * weight_bytes + (4 << 20)
    vmem_limit = int(max(32 << 20, needed))
    if needed <= (48 << 20):
        vmem_limit = min(vmem_limit, 48 << 20)

    cost = pl.CostEstimate(
        flops=int(2 * B * C * C * HW + 4 * B * C * C + 10 * B * C * HW),
        transcendentals=int(B * C),
        bytes_accessed=int(3 * B * C * HW * 4 + (B // Bt) * weight_bytes),
    )

    out = pl.pallas_call(
        kernel,
        out_shape=jax.ShapeDtypeStruct((B, C, HW), jnp.float32),
        grid_spec=pltpu.PrefetchScalarGridSpec(
            num_scalar_prefetch=0,
            grid=grid,
            in_specs=in_specs,
            out_specs=data_spec,
        ),
        compiler_params=pltpu.CompilerParams(
            dimension_semantics=("parallel",),
            vmem_limit_bytes=vmem_limit),
        cost_estimate=cost,
    )(*operands)

    return out.reshape(B, C, H, W)


def adain_reference(base, ref, params):
    """Pure-JAX reference mirroring PyTorch semantics, for verification."""
    w_ref, b_ref, w_g, b_g, w_b, b_b = params
    B, C, H, W = base.shape
    x = base.reshape(B, C, H * W)
    mean = x.mean(axis=-1, keepdims=True)
    var = ((x - mean) ** 2).mean(axis=-1, keepdims=True)
    base_n = (x - mean) / jnp.sqrt(var + EPS)

    r = ref.reshape(B, C, H * W)
    r = jnp.einsum('oc,bcp->bop', w_ref, r) + b_ref[None, :, :]
    r = jnp.maximum(r, 0.0)
    pooled = r.mean(axis=-1, keepdims=True)                       # (B, C, 1)
    gamma = jnp.einsum('oc,bcp->bop', w_g, pooled) + b_g[None, :, :]
    beta = jnp.einsum('oc,bcp->bop', w_b, pooled) + b_b[None, :, :]
    out = base_n * (gamma + 1.0) + beta
    return out.reshape(B, C, H, W)


def init_params(key, channels):
    """Deterministic synthetic parameters (Conv2d 1x1 -> (C_out, C_in) weight + (C,1) bias)."""
    ks = jax.random.split(key, 6)
    scale = 1.0 / jnp.sqrt(channels)
    w_ref = jax.random.uniform(ks[0], (channels, channels), jnp.float32, -scale, scale)
    b_ref = jax.random.uniform(ks[1], (channels, 1), jnp.float32, -scale, scale)
    w_g = jax.random.uniform(ks[2], (channels, channels), jnp.float32, -scale, scale)
    b_g = jax.random.uniform(ks[3], (channels, 1), jnp.float32, -scale, scale)
    w_b = jax.random.uniform(ks[4], (channels, channels), jnp.float32, -scale, scale)
    b_b = jax.random.uniform(ks[5], (channels, 1), jnp.float32, -scale, scale)
    return (w_ref, b_ref, w_g, b_g, w_b, b_b)


if __name__ == "__main__":
    key = jax.random.PRNGKey(0)
    k_base, k_ref, k_params, k2_base, k2_ref, k2_params = jax.random.split(key, 6)

    # Primary small-shape test (tiny C -> VPU channel-mix path), all-f32, tight tolerance.
    B, C, H, W = 2, 4, 16, 16
    base = jax.random.normal(k_base, (B, C, H, W), jnp.float32)
    ref = jax.random.normal(k_ref, (B, C, H, W), jnp.float32)
    params = init_params(k_params, C)

    out = jax.block_until_ready(adain_pallas(base, ref, params))
    expected = adain_reference(base, ref, params)
    assert out.shape == (B, C, H, W)
    assert jnp.allclose(out, expected, atol=1e-3, rtol=1e-3), "mismatch vs reference (small-C path)"

    # Secondary check of the larger-C MXU path (bf16 conv operands -> looser tolerance).
    B2, C2, H2, W2 = 4, 32, 16, 16
    base2 = jax.random.normal(k2_base, (B2, C2, H2, W2), jnp.float32)
    ref2 = jax.random.normal(k2_ref, (B2, C2, H2, W2), jnp.float32)
    params2 = init_params(k2_params, C2)

    out2 = jax.block_until_ready(adain_pallas(base2, ref2, params2))
    expected2 = adain_reference(base2, ref2, params2)
    assert jnp.allclose(out2, expected2, atol=3e-2, rtol=3e-2), "mismatch vs reference (MXU path)"

    print("KERNEL_OK")
</pallas_src>

<mosaic_0001>
module attributes {stable_mosaic.version = 11 : i64} {
  func.func @kernel(%arg0: i32, %arg1: memref<1x4x256xf32, #tpu.memory_space<vmem>>, %arg2: memref<1x4x256xf32, #tpu.memory_space<vmem>>, %arg3: memref<4x4xf32, #tpu.memory_space<smem>>, %arg4: memref<4x1xf32, #tpu.memory_space<smem>>, %arg5: memref<4x4xf32, #tpu.memory_space<smem>>, %arg6: memref<4x1xf32, #tpu.memory_space<smem>>, %arg7: memref<4x4xf32, #tpu.memory_space<smem>>, %arg8: memref<4x1xf32, #tpu.memory_space<smem>>, %arg9: memref<1x4x256xf32, #tpu.memory_space<vmem>>) attributes {dimension_semantics = [#tpu.dimension_semantics<parallel>], iteration_bounds = array<i64: 2>, scalar_prefetch = 0 : i64, scratch_operands = 0 : i64, tpu.core_type = #tpu.core_type<tc>, window_params = [{transform_indices = @transform_0, window_bounds = array<i64: 1, 4, 256>}, {transform_indices = @transform_1, window_bounds = array<i64: 1, 4, 256>}, {transform_indices = @transform_2, window_bounds = array<i64: 4, 4>}, {transform_indices = @transform_3, window_bounds = array<i64: 4, 1>}, {transform_indices = @transform_4, window_bounds = array<i64: 4, 4>}, {transform_indices = @transform_5, window_bounds = array<i64: 4, 1>}, {transform_indices = @transform_6, window_bounds = array<i64: 4, 4>}, {transform_indices = @transform_7, window_bounds = array<i64: 4, 1>}, {transform_indices = @transform_8, window_bounds = array<i64: 1, 4, 256>}]} {
    %c0 = arith.constant 0 : index
    %c0_0 = arith.constant 0 : index
    %c0_1 = arith.constant 0 : index
    %0 = vector.load %arg1[%c0, %c0_0, %c0_1] : memref<1x4x256xf32, #tpu.memory_space<vmem>>, vector<1x4x256xf32>
    %1 = vector.shape_cast %0 : vector<1x4x256xf32> to vector<4x256xf32>
    %cst = arith.constant dense<0.000000e+00> : vector<4xf32>
    %2 = vector.multi_reduction <add>, %1, %cst [1] : vector<4x256xf32> to vector<4xf32>
    %3 = vector.shape_cast %2 : vector<4xf32> to vector<4x1xf32>
    %cst_2 = arith.constant 3.906250e-03 : f32
    %4 = vector.broadcast %cst_2 : f32 to vector<4x1xf32>
    %5 = arith.mulf %3, %4 : vector<4x1xf32>
    %6 = vector.broadcast %5 : vector<4x1xf32> to vector<4x256xf32>
    %7 = arith.subf %1, %6 : vector<4x256xf32>
    %8 = arith.mulf %7, %7 : vector<4x256xf32>
    %cst_3 = arith.constant dense<0.000000e+00> : vector<4xf32>
    %9 = vector.multi_reduction <add>, %8, %cst_3 [1] : vector<4x256xf32> to vector<4xf32>
    %10 = vector.shape_cast %9 : vector<4xf32> to vector<4x1xf32>
    %cst_4 = arith.constant 3.906250e-03 : f32
    %11 = vector.broadcast %cst_4 : f32 to vector<4x1xf32>
    %12 = arith.mulf %10, %11 : vector<4x1xf32>
    %cst_5 = arith.constant 9.99999974E-6 : f32
    %13 = vector.broadcast %cst_5 : f32 to vector<4x1xf32>
    %14 = arith.addf %12, %13 : vector<4x1xf32>
    %15 = math.rsqrt %14 : vector<4x1xf32>
    %16 = vector.broadcast %15 : vector<4x1xf32> to vector<4x256xf32>
    %17 = arith.mulf %7, %16 : vector<4x256xf32>
    %c0_6 = arith.constant 0 : index
    %c0_7 = arith.constant 0 : index
    %c0_8 = arith.constant 0 : index
    %18 = vector.load %arg2[%c0_6, %c0_7, %c0_8] : memref<1x4x256xf32, #tpu.memory_space<vmem>>, vector<1x4x256xf32>
    %19 = vector.shape_cast %18 : vector<1x4x256xf32> to vector<4x256xf32>
    %20 = vector.extract_strided_slice %19 {offsets = [0, 0], sizes = [1, 256], strides = [1, 1]} : vector<4x256xf32> to vector<1x256xf32>
    %21 = vector.extract_strided_slice %19 {offsets = [1, 0], sizes = [1, 256], strides = [1, 1]} : vector<4x256xf32> to vector<1x256xf32>
    %22 = vector.extract_strided_slice %19 {offsets = [2, 0], sizes = [1, 256], strides = [1, 1]} : vector<4x256xf32> to vector<1x256xf32>
    %23 = vector.extract_strided_slice %19 {offsets = [3, 0], sizes = [1, 256], strides = [1, 1]} : vector<4x256xf32> to vector<1x256xf32>
    %c0_9 = arith.constant 0 : index
    %c0_10 = arith.constant 0 : index
    %24 = memref.load %arg3[%c0_9, %c0_10] : memref<4x4xf32, #tpu.memory_space<smem>>
    %25 = vector.broadcast %24 : f32 to vector<1x256xf32>
    %26 = arith.mulf %20, %25 : vector<1x256xf32>
    %c0_11 = arith.constant 0 : index
    %c1 = arith.constant 1 : index
    %27 = memref.load %arg3[%c0_11, %c1] : memref<4x4xf32, #tpu.memory_space<smem>>
    %28 = vector.broadcast %27 : f32 to vector<1x256xf32>
    %29 = arith.mulf %21, %28 : vector<1x256xf32>
    %30 = arith.addf %26, %29 : vector<1x256xf32>
    %c0_12 = arith.constant 0 : index
    %c2 = arith.constant 2 : index
    %31 = memref.load %arg3[%c0_12, %c2] : memref<4x4xf32, #tpu.memory_space<smem>>
    %32 = vector.broadcast %31 : f32 to vector<1x256xf32>
    %33 = arith.mulf %22, %32 : vector<1x256xf32>
    %34 = arith.addf %30, %33 : vector<1x256xf32>
    %c0_13 = arith.constant 0 : index
    %c3 = arith.constant 3 : index
    %35 = memref.load %arg3[%c0_13, %c3] : memref<4x4xf32, #tpu.memory_space<smem>>
    %36 = vector.broadcast %35 : f32 to vector<1x256xf32>
    %37 = arith.mulf %23, %36 : vector<1x256xf32>
    %38 = arith.addf %34, %37 : vector<1x256xf32>
    %c0_14 = arith.constant 0 : index
    %c0_15 = arith.constant 0 : index
    %39 = memref.load %arg4[%c0_14, %c0_15] : memref<4x1xf32, #tpu.memory_space<smem>>
    %40 = vector.broadcast %39 : f32 to vector<1x256xf32>
    %41 = arith.addf %38, %40 : vector<1x256xf32>
    %cst_16 = arith.constant 0.000000e+00 : f32
    %42 = vector.broadcast %cst_16 : f32 to vector<1x256xf32>
    %43 = arith.maximumf %41, %42 : vector<1x256xf32>
    %cst_17 = arith.constant dense<0.000000e+00> : vector<1xf32>
    %44 = vector.multi_reduction <add>, %43, %cst_17 [1] : vector<1x256xf32> to vector<1xf32>
    %45 = vector.shape_cast %44 : vector<1xf32> to vector<1x1xf32>
    %cst_18 = arith.constant 3.906250e-03 : f32
    %46 = vector.broadcast %cst_18 : f32 to vector<1x1xf32>
    %47 = arith.mulf %45, %46 : vector<1x1xf32>
    %c1_19 = arith.constant 1 : index
    %c0_20 = arith.constant 0 : index
    %48 = memref.load %arg3[%c1_19, %c0_20] : memref<4x4xf32, #tpu.memory_space<smem>>
    %49 = vector.broadcast %48 : f32 to vector<1x256xf32>
    %50 = arith.mulf %20, %49 : vector<1x256xf32>
    %c1_21 = arith.constant 1 : index
    %c1_22 = arith.constant 1 : index
    %51 = memref.load %arg3[%c1_21, %c1_22] : memref<4x4xf32, #tpu.memory_space<smem>>
    %52 = vector.broadcast %51 : f32 to vector<1x256xf32>
    %53 = arith.mulf %21, %52 : vector<1x256xf32>
    %54 = arith.addf %50, %53 : vector<1x256xf32>
    %c1_23 = arith.constant 1 : index
    %c2_24 = arith.constant 2 : index
    %55 = memref.load %arg3[%c1_23, %c2_24] : memref<4x4xf32, #tpu.memory_space<smem>>
    %56 = vector.broadcast %55 : f32 to vector<1x256xf32>
    %57 = arith.mulf %22, %56 : vector<1x256xf32>
    %58 = arith.addf %54, %57 : vector<1x256xf32>
    %c1_25 = arith.constant 1 : index
    %c3_26 = arith.constant 3 : index
    %59 = memref.load %arg3[%c1_25, %c3_26] : memref<4x4xf32, #tpu.memory_space<smem>>
    %60 = vector.broadcast %59 : f32 to vector<1x256xf32>
    %61 = arith.mulf %23, %60 : vector<1x256xf32>
    %62 = arith.addf %58, %61 : vector<1x256xf32>
    %c1_27 = arith.constant 1 : index
    %c0_28 = arith.constant 0 : index
    %63 = memref.load %arg4[%c1_27, %c0_28] : memref<4x1xf32, #tpu.memory_space<smem>>
    %64 = vector.broadcast %63 : f32 to vector<1x256xf32>
    %65 = arith.addf %62, %64 : vector<1x256xf32>
    %cst_29 = arith.constant 0.000000e+00 : f32
    %66 = vector.broadcast %cst_29 : f32 to vector<1x256xf32>
    %67 = arith.maximumf %65, %66 : vector<1x256xf32>
    %cst_30 = arith.constant dense<0.000000e+00> : vector<1xf32>
    %68 = vector.multi_reduction <add>, %67, %cst_30 [1] : vector<1x256xf32> to vector<1xf32>
    %69 = vector.shape_cast %68 : vector<1xf32> to vector<1x1xf32>
    %cst_31 = arith.constant 3.906250e-03 : f32
    %70 = vector.broadcast %cst_31 : f32 to vector<1x1xf32>
    %71 = arith.mulf %69, %70 : vector<1x1xf32>
    %c2_32 = arith.constant 2 : index
    %c0_33 = arith.constant 0 : index
    %72 = memref.load %arg3[%c2_32, %c0_33] : memref<4x4xf32, #tpu.memory_space<smem>>
    %73 = vector.broadcast %72 : f32 to vector<1x256xf32>
    %74 = arith.mulf %20, %73 : vector<1x256xf32>
    %c2_34 = arith.constant 2 : index
    %c1_35 = arith.constant 1 : index
    %75 = memref.load %arg3[%c2_34, %c1_35] : memref<4x4xf32, #tpu.memory_space<smem>>
    %76 = vector.broadcast %75 : f32 to vector<1x256xf32>
    %77 = arith.mulf %21, %76 : vector<1x256xf32>
    %78 = arith.addf %74, %77 : vector<1x256xf32>
    %c2_36 = arith.constant 2 : index
    %c2_37 = arith.constant 2 : index
    %79 = memref.load %arg3[%c2_36, %c2_37] : memref<4x4xf32, #tpu.memory_space<smem>>
    %80 = vector.broadcast %79 : f32 to vector<1x256xf32>
    %81 = arith.mulf %22, %80 : vector<1x256xf32>
    %82 = arith.addf %78, %81 : vector<1x256xf32>
    %c2_38 = arith.constant 2 : index
    %c3_39 = arith.constant 3 : index
    %83 = memref.load %arg3[%c2_38, %c3_39] : memref<4x4xf32, #tpu.memory_space<smem>>
    %84 = vector.broadcast %83 : f32 to vector<1x256xf32>
    %85 = arith.mulf %23, %84 : vector<1x256xf32>
    %86 = arith.addf %82, %85 : vector<1x256xf32>
    %c2_40 = arith.constant 2 : index
    %c0_41 = arith.constant 0 : index
    %87 = memref.load %arg4[%c2_40, %c0_41] : memref<4x1xf32, #tpu.memory_space<smem>>
    %88 = vector.broadcast %87 : f32 to vector<1x256xf32>
    %89 = arith.addf %86, %88 : vector<1x256xf32>
    %cst_42 = arith.constant 0.000000e+00 : f32
    %90 = vector.broadcast %cst_42 : f32 to vector<1x256xf32>
    %91 = arith.maximumf %89, %90 : vector<1x256xf32>
    %cst_43 = arith.constant dense<0.000000e+00> : vector<1xf32>
    %92 = vector.multi_reduction <add>, %91, %cst_43 [1] : vector<1x256xf32> to vector<1xf32>
    %93 = vector.shape_cast %92 : vector<1xf32> to vector<1x1xf32>
    %cst_44 = arith.constant 3.906250e-03 : f32
    %94 = vector.broadcast %cst_44 : f32 to vector<1x1xf32>
    %95 = arith.mulf %93, %94 : vector<1x1xf32>
    %c3_45 = arith.constant 3 : index
    %c0_46 = arith.constant 0 : index
    %96 = memref.load %arg3[%c3_45, %c0_46] : memref<4x4xf32, #tpu.memory_space<smem>>
    %97 = vector.broadcast %96 : f32 to vector<1x256xf32>
    %98 = arith.mulf %20, %97 : vector<1x256xf32>
    %c3_47 = arith.constant 3 : index
    %c1_48 = arith.constant 1 : index
    %99 = memref.load %arg3[%c3_47, %c1_48] : memref<4x4xf32, #tpu.memory_space<smem>>
    %100 = vector.broadcast %99 : f32 to vector<1x256xf32>
    %101 = arith.mulf %21, %100 : vector<1x256xf32>
    %102 = arith.addf %98, %101 : vector<1x256xf32>
    %c3_49 = arith.constant 3 : index
    %c2_50 = arith.constant 2 : index
    %103 = memref.load %arg3[%c3_49, %c2_50] : memref<4x4xf32, #tpu.memory_space<smem>>
    %104 = vector.broadcast %103 : f32 to vector<1x256xf32>
    %105 = arith.mulf %22, %104 : vector<1x256xf32>
    %106 = arith.addf %102, %105 : vector<1x256xf32>
    %c3_51 = arith.constant 3 : index
    %c3_52 = arith.constant 3 : index
    %107 = memref.load %arg3[%c3_51, %c3_52] : memref<4x4xf32, #tpu.memory_space<smem>>
    %108 = vector.broadcast %107 : f32 to vector<1x256xf32>
    %109 = arith.mulf %23, %108 : vector<1x256xf32>
    %110 = arith.addf %106, %109 : vector<1x256xf32>
    %c3_53 = arith.constant 3 : index
    %c0_54 = arith.constant 0 : index
    %111 = memref.load %arg4[%c3_53, %c0_54] : memref<4x1xf32, #tpu.memory_space<smem>>
    %112 = vector.broadcast %111 : f32 to vector<1x256xf32>
    %113 = arith.addf %110, %112 : vector<1x256xf32>
    %cst_55 = arith.constant 0.000000e+00 : f32
    %114 = vector.broadcast %cst_55 : f32 to vector<1x256xf32>
    %115 = arith.maximumf %113, %114 : vector<1x256xf32>
    %cst_56 = arith.constant dense<0.000000e+00> : vector<1xf32>
    %116 = vector.multi_reduction <add>, %115, %cst_56 [1] : vector<1x256xf32> to vector<1xf32>
    %117 = vector.shape_cast %116 : vector<1xf32> to vector<1x1xf32>
    %cst_57 = arith.constant 3.906250e-03 : f32
    %118 = vector.broadcast %cst_57 : f32 to vector<1x1xf32>
    %119 = arith.mulf %117, %118 : vector<1x1xf32>
    %c0_58 = arith.constant 0 : index
    %c0_59 = arith.constant 0 : index
    %120 = memref.load %arg5[%c0_58, %c0_59] : memref<4x4xf32, #tpu.memory_space<smem>>
    %121 = vector.broadcast %120 : f32 to vector<1x1xf32>
    %122 = arith.mulf %47, %121 : vector<1x1xf32>
    %c0_60 = arith.constant 0 : index
    %c0_61 = arith.constant 0 : index
    %123 = memref.load %arg7[%c0_60, %c0_61] : memref<4x4xf32, #tpu.memory_space<smem>>
    %124 = vector.broadcast %123 : f32 to vector<1x1xf32>
    %125 = arith.mulf %47, %124 : vector<1x1xf32>
    %c0_62 = arith.constant 0 : index
    %c1_63 = arith.constant 1 : index
    %126 = memref.load %arg5[%c0_62, %c1_63] : memref<4x4xf32, #tpu.memory_space<smem>>
    %127 = vector.broadcast %126 : f32 to vector<1x1xf32>
    %128 = arith.mulf %71, %127 : vector<1x1xf32>
    %129 = arith.addf %122, %128 : vector<1x1xf32>
    %c0_64 = arith.constant 0 : index
    %c1_65 = arith.constant 1 : index
    %130 = memref.load %arg7[%c0_64, %c1_65] : memref<4x4xf32, #tpu.memory_space<smem>>
    %131 = vector.broadcast %130 : f32 to vector<1x1xf32>
    %132 = arith.mulf %71, %131 : vector<1x1xf32>
    %133 = arith.addf %125, %132 : vector<1x1xf32>
    %c0_66 = arith.constant 0 : index
    %c2_67 = arith.constant 2 : index
    %134 = memref.load %arg5[%c0_66, %c2_67] : memref<4x4xf32, #tpu.memory_space<smem>>
    %135 = vector.broadcast %134 : f32 to vector<1x1xf32>
    %136 = arith.mulf %95, %135 : vector<1x1xf32>
    %137 = arith.addf %129, %136 : vector<1x1xf32>
    %c0_68 = arith.constant 0 : index
    %c2_69 = arith.constant 2 : index
    %138 = memref.load %arg7[%c0_68, %c2_69] : memref<4x4xf32, #tpu.memory_space<smem>>
    %139 = vector.broadcast %138 : f32 to vector<1x1xf32>
    %140 = arith.mulf %95, %139 : vector<1x1xf32>
    %141 = arith.addf %133, %140 : vector<1x1xf32>
    %c0_70 = arith.constant 0 : index
    %c3_71 = arith.constant 3 : index
    %142 = memref.load %arg5[%c0_70, %c3_71] : memref<4x4xf32, #tpu.memory_space<smem>>
    %143 = vector.broadcast %142 : f32 to vector<1x1xf32>
    %144 = arith.mulf %119, %143 : vector<1x1xf32>
    %145 = arith.addf %137, %144 : vector<1x1xf32>
    %c0_72 = arith.constant 0 : index
    %c3_73 = arith.constant 3 : index
    %146 = memref.load %arg7[%c0_72, %c3_73] : memref<4x4xf32, #tpu.memory_space<smem>>
    %147 = vector.broadcast %146 : f32 to vector<1x1xf32>
    %148 = arith.mulf %119, %147 : vector<1x1xf32>
    %149 = arith.addf %141, %148 : vector<1x1xf32>
    %c0_74 = arith.constant 0 : index
    %c0_75 = arith.constant 0 : index
    %150 = memref.load %arg6[%c0_74, %c0_75] : memref<4x1xf32, #tpu.memory_space<smem>>
    %cst_76 = arith.constant 1.000000e+00 : f32
    %151 = arith.addf %150, %cst_76 : f32
    %152 = vector.broadcast %151 : f32 to vector<1x1xf32>
    %153 = arith.addf %145, %152 : vector<1x1xf32>
    %c0_77 = arith.constant 0 : index
    %c0_78 = arith.constant 0 : index
    %154 = memref.load %arg8[%c0_77, %c0_78] : memref<4x1xf32, #tpu.memory_space<smem>>
    %155 = vector.broadcast %154 : f32 to vector<1x1xf32>
    %156 = arith.addf %149, %155 : vector<1x1xf32>
    %c1_79 = arith.constant 1 : index
    %c0_80 = arith.constant 0 : index
    %157 = memref.load %arg5[%c1_79, %c0_80] : memref<4x4xf32, #tpu.memory_space<smem>>
    %158 = vector.broadcast %157 : f32 to vector<1x1xf32>
    %159 = arith.mulf %47, %158 : vector<1x1xf32>
    %c1_81 = arith.constant 1 : index
    %c0_82 = arith.constant 0 : index
    %160 = memref.load %arg7[%c1_81, %c0_82] : memref<4x4xf32, #tpu.memory_space<smem>>
    %161 = vector.broadcast %160 : f32 to vector<1x1xf32>
    %162 = arith.mulf %47, %161 : vector<1x1xf32>
    %c1_83 = arith.constant 1 : index
    %c1_84 = arith.constant 1 : index
    %163 = memref.load %arg5[%c1_83, %c1_84] : memref<4x4xf32, #tpu.memory_space<smem>>
    %164 = vector.broadcast %163 : f32 to vector<1x1xf32>
    %165 = arith.mulf %71, %164 : vector<1x1xf32>
    %166 = arith.addf %159, %165 : vector<1x1xf32>
    %c1_85 = arith.constant 1 : index
    %c1_86 = arith.constant 1 : index
    %167 = memref.load %arg7[%c1_85, %c1_86] : memref<4x4xf32, #tpu.memory_space<smem>>
    %168 = vector.broadcast %167 : f32 to vector<1x1xf32>
    %169 = arith.mulf %71, %168 : vector<1x1xf32>
    %170 = arith.addf %162, %169 : vector<1x1xf32>
    %c1_87 = arith.constant 1 : index
    %c2_88 = arith.constant 2 : index
    %171 = memref.load %arg5[%c1_87, %c2_88] : memref<4x4xf32, #tpu.memory_space<smem>>
    %172 = vector.broadcast %171 : f32 to vector<1x1xf32>
    %173 = arith.mulf %95, %172 : vector<1x1xf32>
    %174 = arith.addf %166, %173 : vector<1x1xf32>
    %c1_89 = arith.constant 1 : index
    %c2_90 = arith.constant 2 : index
    %175 = memref.load %arg7[%c1_89, %c2_90] : memref<4x4xf32, #tpu.memory_space<smem>>
    %176 = vector.broadcast %175 : f32 to vector<1x1xf32>
    %177 = arith.mulf %95, %176 : vector<1x1xf32>
    %178 = arith.addf %170, %177 : vector<1x1xf32>
    %c1_91 = arith.constant 1 : index
    %c3_92 = arith.constant 3 : index
    %179 = memref.load %arg5[%c1_91, %c3_92] : memref<4x4xf32, #tpu.memory_space<smem>>
    %180 = vector.broadcast %179 : f32 to vector<1x1xf32>
    %181 = arith.mulf %119, %180 : vector<1x1xf32>
    %182 = arith.addf %174, %181 : vector<1x1xf32>
    %c1_93 = arith.constant 1 : index
    %c3_94 = arith.constant 3 : index
    %183 = memref.load %arg7[%c1_93, %c3_94] : memref<4x4xf32, #tpu.memory_space<smem>>
    %184 = vector.broadcast %183 : f32 to vector<1x1xf32>
    %185 = arith.mulf %119, %184 : vector<1x1xf32>
    %186 = arith.addf %178, %185 : vector<1x1xf32>
    %c1_95 = arith.constant 1 : index
    %c0_96 = arith.constant 0 : index
    %187 = memref.load %arg6[%c1_95, %c0_96] : memref<4x1xf32, #tpu.memory_space<smem>>
    %cst_97 = arith.constant 1.000000e+00 : f32
    %188 = arith.addf %187, %cst_97 : f32
    %189 = vector.broadcast %188 : f32 to vector<1x1xf32>
    %190 = arith.addf %182, %189 : vector<1x1xf32>
    %c1_98 = arith.constant 1 : index
    %c0_99 = arith.constant 0 : index
    %191 = memref.load %arg8[%c1_98, %c0_99] : memref<4x1xf32, #tpu.memory_space<smem>>
    %192 = vector.broadcast %191 : f32 to vector<1x1xf32>
    %193 = arith.addf %186, %192 : vector<1x1xf32>
    %c2_100 = arith.constant 2 : index
    %c0_101 = arith.constant 0 : index
    %194 = memref.load %arg5[%c2_100, %c0_101] : memref<4x4xf32, #tpu.memory_space<smem>>
    %195 = vector.broadcast %194 : f32 to vector<1x1xf32>
    %196 = arith.mulf %47, %195 : vector<1x1xf32>
    %c2_102 = arith.constant 2 : index
    %c0_103 = arith.constant 0 : index
    %197 = memref.load %arg7[%c2_102, %c0_103] : memref<4x4xf32, #tpu.memory_space<smem>>
    %198 = vector.broadcast %197 : f32 to vector<1x1xf32>
    %199 = arith.mulf %47, %198 : vector<1x1xf32>
    %c2_104 = arith.constant 2 : index
    %c1_105 = arith.constant 1 : index
    %200 = memref.load %arg5[%c2_104, %c1_105] : memref<4x4xf32, #tpu.memory_space<smem>>
    %201 = vector.broadcast %200 : f32 to vector<1x1xf32>
    %202 = arith.mulf %71, %201 : vector<1x1xf32>
    %203 = arith.addf %196, %202 : vector<1x1xf32>
    %c2_106 = arith.constant 2 : index
    %c1_107 = arith.constant 1 : index
    %204 = memref.load %arg7[%c2_106, %c1_107] : memref<4x4xf32, #tpu.memory_space<smem>>
    %205 = vector.broadcast %204 : f32 to vector<1x1xf32>
    %206 = arith.mulf %71, %205 : vector<1x1xf32>
    %207 = arith.addf %199, %206 : vector<1x1xf32>
    %c2_108 = arith.constant 2 : index
    %c2_109 = arith.constant 2 : index
    %208 = memref.load %arg5[%c2_108, %c2_109] : memref<4x4xf32, #tpu.memory_space<smem>>
    %209 = vector.broadcast %208 : f32 to vector<1x1xf32>
    %210 = arith.mulf %95, %209 : vector<1x1xf32>
    %211 = arith.addf %203, %210 : vector<1x1xf32>
    %c2_110 = arith.constant 2 : index
    %c2_111 = arith.constant 2 : index
    %212 = memref.load %arg7[%c2_110, %c2_111] : memref<4x4xf32, #tpu.memory_space<smem>>
    %213 = vector.broadcast %212 : f32 to vector<1x1xf32>
    %214 = arith.mulf %95, %213 : vector<1x1xf32>
    %215 = arith.addf %207, %214 : vector<1x1xf32>
    %c2_112 = arith.constant 2 : index
    %c3_113 = arith.constant 3 : index
    %216 = memref.load %arg5[%c2_112, %c3_113] : memref<4x4xf32, #tpu.memory_space<smem>>
    %217 = vector.broadcast %216 : f32 to vector<1x1xf32>
    %218 = arith.mulf %119, %217 : vector<1x1xf32>
    %219 = arith.addf %211, %218 : vector<1x1xf32>
    %c2_114 = arith.constant 2 : index
    %c3_115 = arith.constant 3 : index
    %220 = memref.load %arg7[%c2_114, %c3_115] : memref<4x4xf32, #tpu.memory_space<smem>>
    %221 = vector.broadcast %220 : f32 to vector<1x1xf32>
    %222 = arith.mulf %119, %221 : vector<1x1xf32>
    %223 = arith.addf %215, %222 : vector<1x1xf32>
    %c2_116 = arith.constant 2 : index
    %c0_117 = arith.constant 0 : index
    %224 = memref.load %arg6[%c2_116, %c0_117] : memref<4x1xf32, #tpu.memory_space<smem>>
    %cst_118 = arith.constant 1.000000e+00 : f32
    %225 = arith.addf %224, %cst_118 : f32
    %226 = vector.broadcast %225 : f32 to vector<1x1xf32>
    %227 = arith.addf %219, %226 : vector<1x1xf32>
    %c2_119 = arith.constant 2 : index
    %c0_120 = arith.constant 0 : index
    %228 = memref.load %arg8[%c2_119, %c0_120] : memref<4x1xf32, #tpu.memory_space<smem>>
    %229 = vector.broadcast %228 : f32 to vector<1x1xf32>
    %230 = arith.addf %223, %229 : vector<1x1xf32>
    %c3_121 = arith.constant 3 : index
    %c0_122 = arith.constant 0 : index
    %231 = memref.load %arg5[%c3_121, %c0_122] : memref<4x4xf32, #tpu.memory_space<smem>>
    %232 = vector.broadcast %231 : f32 to vector<1x1xf32>
    %233 = arith.mulf %47, %232 : vector<1x1xf32>
    %c3_123 = arith.constant 3 : index
    %c0_124 = arith.constant 0 : index
    %234 = memref.load %arg7[%c3_123, %c0_124] : memref<4x4xf32, #tpu.memory_space<smem>>
    %235 = vector.broadcast %234 : f32 to vector<1x1xf32>
    %236 = arith.mulf %47, %235 : vector<1x1xf32>
    %c3_125 = arith.constant 3 : index
    %c1_126 = arith.constant 1 : index
    %237 = memref.load %arg5[%c3_125, %c1_126] : memref<4x4xf32, #tpu.memory_space<smem>>
    %238 = vector.broadcast %237 : f32 to vector<1x1xf32>
    %239 = arith.mulf %71, %238 : vector<1x1xf32>
    %240 = arith.addf %233, %239 : vector<1x1xf32>
    %c3_127 = arith.constant 3 : index
    %c1_128 = arith.constant 1 : index
    %241 = memref.load %arg7[%c3_127, %c1_128] : memref<4x4xf32, #tpu.memory_space<smem>>
    %242 = vector.broadcast %241 : f32 to vector<1x1xf32>
    %243 = arith.mulf %71, %242 : vector<1x1xf32>
    %244 = arith.addf %236, %243 : vector<1x1xf32>
    %c3_129 = arith.constant 3 : index
    %c2_130 = arith.constant 2 : index
    %245 = memref.load %arg5[%c3_129, %c2_130] : memref<4x4xf32, #tpu.memory_space<smem>>
    %246 = vector.broadcast %245 : f32 to vector<1x1xf32>
    %247 = arith.mulf %95, %246 : vector<1x1xf32>
    %248 = arith.addf %240, %247 : vector<1x1xf32>
    %c3_131 = arith.constant 3 : index
    %c2_132 = arith.constant 2 : index
    %249 = memref.load %arg7[%c3_131, %c2_132] : memref<4x4xf32, #tpu.memory_space<smem>>
    %250 = vector.broadcast %249 : f32 to vector<1x1xf32>
    %251 = arith.mulf %95, %250 : vector<1x1xf32>
    %252 = arith.addf %244, %251 : vector<1x1xf32>
    %c3_133 = arith.constant 3 : index
    %c3_134 = arith.constant 3 : index
    %253 = memref.load %arg5[%c3_133, %c3_134] : memref<4x4xf32, #tpu.memory_space<smem>>
    %254 = vector.broadcast %253 : f32 to vector<1x1xf32>
    %255 = arith.mulf %119, %254 : vector<1x1xf32>
    %256 = arith.addf %248, %255 : vector<1x1xf32>
    %c3_135 = arith.constant 3 : index
    %c3_136 = arith.constant 3 : index
    %257 = memref.load %arg7[%c3_135, %c3_136] : memref<4x4xf32, #tpu.memory_space<smem>>
    %258 = vector.broadcast %257 : f32 to vector<1x1xf32>
    %259 = arith.mulf %119, %258 : vector<1x1xf32>
    %260 = arith.addf %252, %259 : vector<1x1xf32>
    %c3_137 = arith.constant 3 : index
    %c0_138 = arith.constant 0 : index
    %261 = memref.load %arg6[%c3_137, %c0_138] : memref<4x1xf32, #tpu.memory_space<smem>>
    %cst_139 = arith.constant 1.000000e+00 : f32
    %262 = arith.addf %261, %cst_139 : f32
    %263 = vector.broadcast %262 : f32 to vector<1x1xf32>
    %264 = arith.addf %256, %263 : vector<1x1xf32>
    %c3_140 = arith.constant 3 : index
    %c0_141 = arith.constant 0 : index
    %265 = memref.load %arg8[%c3_140, %c0_141] : memref<4x1xf32, #tpu.memory_space<smem>>
    %266 = vector.broadcast %265 : f32 to vector<1x1xf32>
    %267 = arith.addf %260, %266 : vector<1x1xf32>
    %268 = tpu.concatenate %153, %190, %227, %264 in 0 : vector<1x1xf32>, vector<1x1xf32>, vector<1x1xf32>, vector<1x1xf32> -> vector<4x1xf32>
    %269 = tpu.concatenate %156, %193, %230, %267 in 0 : vector<1x1xf32>, vector<1x1xf32>, vector<1x1xf32>, vector<1x1xf32> -> vector<4x1xf32>
    %270 = vector.broadcast %268 : vector<4x1xf32> to vector<4x256xf32>
    %271 = arith.mulf %17, %270 : vector<4x256xf32>
    %272 = vector.broadcast %269 : vector<4x1xf32> to vector<4x256xf32>
    %273 = arith.addf %271, %272 : vector<4x256xf32>
    %c0_142 = arith.constant 0 : index
    %c0_143 = arith.constant 0 : index
    %c0_144 = arith.constant 0 : index
    %274 = vector.load %arg9[%c0_142, %c0_143, %c0_144] : memref<1x4x256xf32, #tpu.memory_space<vmem>>, vector<1x4x256xf32>
    %275 = vector.shape_cast %274 : vector<1x4x256xf32> to vector<4x256xf32>
    %276 = vector.shape_cast %273 : vector<4x256xf32> to vector<1x4x256xf32>
    tpu.vector_store %arg9[%c0_142, %c0_143, %c0_144], %276 {strides = array<i32>} : memref<1x4x256xf32, #tpu.memory_space<vmem>>, vector<1x4x256xf32>,
    return
  }
  func.func @transform_0(%arg0: i32) -> (i32, i32, i32) {
    %c0_i32 = arith.constant 0 : i32
    %c0_i32_0 = arith.constant 0 : i32
    %c0_i32_1 = arith.constant 0 : i32
    return %arg0, %c0_i32, %c0_i32_0 : i32, i32, i32
  }
  func.func @transform_1(%arg0: i32) -> (i32, i32, i32) {
    %c0_i32 = arith.constant 0 : i32
    %c0_i32_0 = arith.constant 0 : i32
    %c0_i32_1 = arith.constant 0 : i32
    return %arg0, %c0_i32, %c0_i32_0 : i32, i32, i32
  }
  func.func @transform_2(%arg0: i32) -> (i32, i32) {
    %c0_i32 = arith.constant 0 : i32
    %c0_i32_0 = arith.constant 0 : i32
    %c0_i32_1 = arith.constant 0 : i32
    return %c0_i32, %c0_i32_0 : i32, i32
  }
  func.func @transform_3(%arg0: i32) -> (i32, i32) {
    %c0_i32 = arith.constant 0 : i32
    %c0_i32_0 = arith.constant 0 : i32
    %c0_i32_1 = arith.constant 0 : i32
    return %c0_i32, %c0_i32_0 : i32, i32
  }
  func.func @transform_4(%arg0: i32) -> (i32, i32) {
    %c0_i32 = arith.constant 0 : i32
    %c0_i32_0 = arith.constant 0 : i32
    %c0_i32_1 = arith.constant 0 : i32
    return %c0_i32, %c0_i32_0 : i32, i32
  }
  func.func @transform_5(%arg0: i32) -> (i32, i32) {
    %c0_i32 = arith.constant 0 : i32
    %c0_i32_0 = arith.constant 0 : i32
    %c0_i32_1 = arith.constant 0 : i32
    return %c0_i32, %c0_i32_0 : i32, i32
  }
  func.func @transform_6(%arg0: i32) -> (i32, i32) {
    %c0_i32 = arith.constant 0 : i32
    %c0_i32_0 = arith.constant 0 : i32
    %c0_i32_1 = arith.constant 0 : i32
    return %c0_i32, %c0_i32_0 : i32, i32
  }
  func.func @transform_7(%arg0: i32) -> (i32, i32) {
    %c0_i32 = arith.constant 0 : i32
    %c0_i32_0 = arith.constant 0 : i32
    %c0_i32_1 = arith.constant 0 : i32
    return %c0_i32, %c0_i32_0 : i32, i32
  }
  func.func @transform_8(%arg0: i32) -> (i32, i32, i32) {
    %c0_i32 = arith.constant 0 : i32
    %c0_i32_0 = arith.constant 0 : i32
    %c0_i32_1 = arith.constant 0 : i32
    return %arg0, %c0_i32, %c0_i32_0 : i32, i32, i32
  }
}

</mosaic_0001>

<bundles_post_ra>
// kernel: tpu_custom_call.1
= control target key start
LH: loop header
LB: loop body
LE: loop exit
PB: predicated region body
PF: predicated region fallthrough
CT: control target
= control target key end

     0   :  { %s1998_s0 = inlined_call_operand.hbm [shape: f32[2,4,256], index: 0, kind: input, shape index: {}]   ;;  %s1999_s1 = inlined_call_operand.vmem [shape: f32[2,4,256], index: 1, kind: input, shape index: {}]   ;;  %s2000_s2 = inlined_call_operand.vmem [shape: f32[4,4], index: 2, kind: input, shape index: {}]   ;;  %s2001_s3 = inlined_call_operand.vmem [shape: f32[4,1], index: 3, kind: input, shape index: {}]   ;;  %s2002_s4 = inlined_call_operand.vmem [shape: f32[4,4], index: 4, kind: input, shape index: {}]   ;;  %s2003_s5 = inlined_call_operand.vmem [shape: f32[4,1], index: 5, kind: input, shape index: {}]   ;;  %s2004_s6 = inlined_call_operand.vmem [shape: f32[4,4], index: 6, kind: input, shape index: {}]   ;;  %s2005_s7 = inlined_call_operand.vmem [shape: f32[4,1], index: 7, kind: input, shape index: {}]   ;;  %s2006_s8 = inlined_call_operand.hbm [shape: f32[2,4,256], index: 8, kind: output, shape index: {}]  }
   0x1   :  { %2027 = sst [smem:[#allocation38_spill]] %s1998_s0 }
   0x2   :  { %2028 = sst [smem:[#allocation39_spill]] %s1999_s1 }
   0x3   :  { %2029 = sst [smem:[#allocation40_spill]] %s2000_s2 }
   0x4   :  { %2030 = sst [smem:[#allocation41_spill]] %s2001_s3 }
   0x5   :  { %2031 = sst [smem:[#allocation42_spill]] %s2002_s4 }
   0x6   :  { %2032 = sst [smem:[#allocation43_spill]] %s2003_s5 }
   0x7   :  { %2033 = sst [smem:[#allocation44_spill]] %s2004_s6 }
   0x8   :  { %2034 = sst [smem:[#allocation45_spill]] %s2005_s7 }
   0x9   :  { %2035 = sst [smem:[#allocation46_spill]] %s2006_s8 }
   0xa   :  { %13 = vsyncpa [#allocation3], 0 }
   0xb   :  { %15 = vsyncpa [#allocation3 + $0x1], 0 }
   0xc   :  { %16 = vsyncpa [#allocation5], 0 }
   0xd   :  { %17 = vsyncpa [#allocation8], 0 }
   0xe   :  { %18 = vsyncpa [#allocation11], 0 }
   0xf   :  { %19 = vsyncpa [#allocation14], 0 }
  0x10   :  { %20 = vsyncpa [#allocation4], 0 }
  0x11   :  { %22 = vsyncpa [#allocation4 + $0x1], 0  ;;  %s1484_s27 = smov 0   ;;  %s1486_s28 = smov 0  }
  0x12   :  { %s1488_s29 = smov 0   ;;  %s1490_s30 = smov 0  }
  0x13 LB: > { %2036 = sst [smem:[#allocation22_spill]] %s1415_s27  ;;  %s2040_s3 = sld [smem:[#allocation41_spill]]  ;;  %s1427_s30 = sphi %s1490_s30, %s2095_s30   ;;  %s1423_s29 = sphi %s1488_s29, %s2098_s29   ;;  %s1419_s28 = sphi %s1486_s28, %s2097_s28   ;;  %s1415_s27 = sphi %s1484_s27, %s2096_s27  }
  0x14   : > { %2037 = sst [smem:[#allocation23_spill]] %s1419_s28  ;;  %s1508_s12 = sadd.s32 4294967295, %s1427_s30  }
  0x15   : > { %2038 = sst [smem:[#allocation24_spill]] %s1423_s29  ;;  %p1015_p0 = scmp.ge.s32.totalorder %s1427_s30, 1 }
  0x16   : > { %2039 = sst [smem:[#allocation25_spill]] %s1427_s30  ;;  %p2007_p1 = scmp.eq.s32.totalorder %s1508_s12, 0 }
  0x17   : > { %2041 = sst [smem:[#allocation26_spill]] %s1508_s12  ;;  %p237_p2 = scmp.lt.s32.totalorder %s1427_s30, 3 }
  0x18   : > { %s2043_s5 = sld [smem:[#allocation43_spill]]  ;;  %s2044_s2 = sld [smem:[#allocation40_spill]] }
  0x19   : > { %s261_s11 = sshll.u32 %s2040_s3, 4  ;;  %p1513_p3 = pnand %p1015_p0, %p237_p2  ;;  %s262_s11 = int_to_ptr.vmem [resolvable:$true] %s261_s11 }
  0x1a   : > { %s2046_s4 = sld [smem:[#allocation42_spill]]  ;;  %s1225_s24 = scalar_lea.vmem %s262_s11, 64 }
  0x1b   : > { %s2042_s13 = scalar_select %p1513_p3, 1, 0 }
  0x1c   : > { %p1139_p5 = pneg %p1513_p3  ;;  %p1226_p7 = scmp.ne.s32.totalorder %s262_s11, %s1225_s24 }
  0x1d   : > { %p1233_p11 = scmp.lt.s32.totalorder %s262_s11, %s262_s11  ;;  %p1234_p12 = scmp.lt.s32.totalorder %s1225_s24, %s1225_s24 }
  0x1e   : > { %s283_s16 = sshll.u32 %s2043_s5, 4  ;;  %s250_s19 = sshll.u32 %s2044_s2, 4  ;;  %s284_s16 = int_to_ptr.vmem [resolvable:$true] %s283_s16  ;;  %s1532_s19 = int_to_ptr.vmem [resolvable:$true] %s250_s19 }
  0x1f   : > { %p1528_p6 = pnand %p1139_p5, %p2007_p1  ;;  %p1235_p13 = por %p1234_p12, %p1233_p11 }
  0x20   : > { %s272_s23 = sshll.u32 %s2046_s4, 4  ;;  %s1537_s23 = int_to_ptr.vmem [resolvable:$true] %s272_s23 }
  0x21   : > { %p1541_p8 = pneg %p1528_p6 }
  0x23   : > { %p1228_p9 = pnand %p1541_p8, %p1226_p7 }
  0x25   : > { %p1229_p10 = pneg %p1228_p9 }
  0x27   : > { %p1236_p0 = pnand %p1235_p13, %p1229_p10 }
  0x29   : > { %1239 = shalt.err (!%p1236_p0)
}
  0x2a   : > { %s1429_s26 = smov [#allocation7]   ;;  %s1240_s9 = scalar_lea.vmem %s284_s16, 64 }
  0x2b   : > { %1145 = dma.vmem_to_smem (!%p1528_p6), %s262_s11, 64, %s1429_s26, [#allocation8]  }
  0x2c   : > { %p1241_p2 = scmp.ne.s32.totalorder %s284_s16, %s1240_s9  ;;  %p1248_p1 = scmp.lt.s32.totalorder %s284_s16, %s284_s16 }
  0x2d   : > { %p1249_p3 = scmp.lt.s32.totalorder %s1240_s9, %s1240_s9 }
  0x2e   : > { %p1243_p5 = pnand %p1241_p2, %p1541_p8 }
  0x2f   : > { %p1250_p7 = por %p1249_p3, %p1248_p1 }
  0x30   : > { %p1244_p4 = pneg %p1243_p5 }
  0x32   : > { %p1251_p9 = pnand %p1250_p7, %p1244_p4 }
  0x34   : > { %1254 = shalt.err (!%p1251_p9)
}
  0x35   : > { %s1430_s10 = smov [#allocation10]   ;;  %s1255_s14 = scalar_lea.vmem %s1532_s19, 64 }
  0x36   : > { %1151 = dma.vmem_to_smem (!%p1528_p6), %s284_s16, 64, %s1430_s10, [#allocation11]  }
  0x37   : > { %p1256_p10 = scmp.ne.s32.totalorder %s1532_s19, %s1255_s14  ;;  %p1263_p13 = scmp.lt.s32.totalorder %s1532_s19, %s1532_s19 }
  0x38   : > { %p1264_p0 = scmp.lt.s32.totalorder %s1255_s14, %s1255_s14 }
  0x39   : > { %p1258_p11 = pnand %p1256_p10, %p1541_p8 }
  0x3a   : > { %p1265_p2 = por %p1264_p0, %p1263_p13 }
  0x3b   : > { %p1259_p12 = pneg %p1258_p11 }
  0x3d   : > { %p1266_p1 = pnand %p1265_p2, %p1259_p12 }
  0x3f   : > { %1269 = shalt.err (!%p1266_p1)
}
  0x40   : > { %s1431_s11 = smov [#allocation6]   ;;  %s1270_s15 = scalar_lea.vmem %s1537_s23, 64 }
  0x41   : > { %1142 = dma.vmem_to_smem (!%p1528_p6), %s1532_s19, 64, %s1431_s11, [#allocation5]  }
  0x42   : > { %p1271_p3 = scmp.ne.s32.totalorder %s1537_s23, %s1270_s15  ;;  %p1278_p7 = scmp.lt.s32.totalorder %s1537_s23, %s1537_s23 }
  0x43   : > { %p1279_p9 = scmp.lt.s32.totalorder %s1270_s15, %s1270_s15 }
  0x44   : > { %p1273_p4 = pnand %p1271_p3, %p1541_p8 }
  0x45   : > { %p1280_p10 = por %p1279_p9, %p1278_p7 }
  0x46   : > { %p1274_p5 = pneg %p1273_p4 }
  0x48   : > { %p1281_p11 = pnand %p1280_p10, %p1274_p5 }
  0x4a   : > { %1284 = shalt.err (!%p1281_p11)
}
  0x4b   : > { %s1432_s16 = smov [#allocation9]   ;;  %s2048_s6 = sld [smem:[#allocation44_spill]] }
  0x4c   : > { %1148 = dma.vmem_to_smem (!%p1528_p6), %s1537_s23, 64, %s1432_s16, [#allocation8]  }
  0x4d   : > { %s2049_s7 = sld [smem:[#allocation45_spill]] }
  0x51   : > { %s294_s19 = sshll.u32 %s2048_s6, 4  ;;  %s295_s19 = int_to_ptr.vmem [resolvable:$true] %s294_s19 }
  0x52   : > { %s1285_s26 = scalar_lea.vmem %s295_s19, 64  ;;  %p1293_p2 = scmp.lt.s32.totalorder %s295_s19, %s295_s19 }
  0x53   : > { %s305_s24 = sshll.u32 %s2049_s7, 4  ;;  %p1286_p12 = scmp.ne.s32.totalorder %s295_s19, %s1285_s26  ;;  %s306_s24 = int_to_ptr.vmem [resolvable:$true] %s305_s24 }
  0x54   : > { %p1294_p1 = scmp.lt.s32.totalorder %s1285_s26, %s1285_s26 }
  0x55   : > { %p1288_p13 = pnand %p1286_p12, %p1541_p8 }
  0x56   : > { %p1295_p3 = por %p1294_p1, %p1293_p2 }
  0x57   : > { %p1289_p0 = pneg %p1288_p13 }
  0x59   : > { %p1296_p4 = pnand %p1295_p3, %p1289_p0 }
  0x5b   : > { %1299 = shalt.err (!%p1296_p4)
}
  0x5c   : > { %s1433_s23 = smov [#allocation12]   ;;  %s1300_s9 = scalar_lea.vmem %s306_s24, 64 }
  0x5d   : > { %1154 = dma.vmem_to_smem (!%p1528_p6), %s295_s19, 64, %s1433_s23, [#allocation11]  }
  0x5e   : > { %p1301_p5 = scmp.ne.s32.totalorder %s306_s24, %s1300_s9  ;;  %p1308_p10 = scmp.lt.s32.totalorder %s306_s24, %s306_s24 }
  0x5f   : > { %p1309_p11 = scmp.lt.s32.totalorder %s1300_s9, %s1300_s9 }
  0x60   : > { %p1303_p7 = pnand %p1301_p5, %p1541_p8 }
  0x61   : > { %p1310_p12 = por %p1309_p11, %p1308_p10 }
  0x62   : > { %p1304_p9 = pneg %p1303_p7 }
  0x64   : > { %p1311_p13 = pnand %p1310_p12, %p1304_p9 }
  0x66   : > { %1314 = shalt.err (!%p1311_p13)
}
  0x67   : > { %s1434_s10 = smov [#allocation13]   ;;  %s1014_s25 = sadd.s32 4294967294, %s1427_s30  }
  0x68   : > { %1157 = dma.vmem_to_smem (!%p1528_p6), %s306_s24, 64, %s1434_s10, [#allocation14]  }
  0x69   : > { %s1587_s14 = sadd.s32 1, %s1427_s30   ;;  %s35_s11 = sadd.s32 1, %s1423_s29 }
  0x6a   : > { %2050 = sst [smem:[#allocation27_spill]] %s1587_s14  ;;  %s32_s20 = ssub.s32 %s1427_s30, %s1587_s14 }
  0x6b   : > { %p33_p8 = scmp.eq.s32.totalorder %s32_s20, 0  ;;  %p42_p0 = scmp.ne.s32.totalorder %s1423_s29, %s1419_s28 }
  0x6c   : > { %p43_p2 = scmp.eq.s32.totalorder %s1427_s30, 0  ;;  %p48_p1 = scmp.ne.s32.totalorder %s1419_s28, %s1415_s27 }
  0x6d   : > { %s1598_s15 = scalar_select %p33_p8, %s1423_s29, %s35_s11  }
  0x6e   : > { %p1600_p3 = por %p43_p2, %p42_p0  ;;  %p2053_p4 = scmp.eq.s32.totalorder %s1508_s12, 0 }
  0x6f   : > { %2051 = sst [smem:[#allocation28_spill]] %s1598_s15  ;;  %p224_p5 = scmp.eq.s32.totalorder %s1508_s12, 1 }
  0x70   : > { %p1606_p6 = por %p2053_p4, %p48_p1  ;;  %p230_p7 = scmp.eq.s32.totalorder %s1014_s25, 1 }
  0x71   : > { %p1172_p9 = scmp.lt.s32.totalorder %s1427_s30, 2  ;;  %s316_s18 = sand.u32 1, %s1423_s29  }
  0x72   : > { %p1613_p10 = por %p224_p5, %p42_p0  ;;  %p1617_p11 = por %p230_p7, %p48_p1 }
  0x73   : > { %s1023_s22 = sshll.u32 %s316_s18, 3  ;;  %s1108_s24 = sshll.u32 %s1427_s30, 7 }
  0x74   : > { %s2055_s19 = scalar_select %p1613_p10, 1, 0 }
  0x75   : > { %s2057_s21 = scalar_select %p1617_p11, 1, 0 }
  0x76   : > { %2056 = sst [smem:[#allocation29_spill]] %s2055_s19  ;;  %s320_s10 = scalar_lea.vmem [#allocation2], %s1023_s22 }
  0x77   : > { %2058 = sst [smem:[#allocation30_spill]] %s2057_s21  ;;  %s2059_s0 = sld [smem:[#allocation38_spill]] }
  0x78   : > { %s328_s25 = sshll.u32 %s320_s10, 4  ;;  %p1631_p12 = pnand %p1172_p9, %p1600_p3  ;;  %s1627_s25 = int_to_ptr.vmem [resolvable:$true] %s328_s25 }
  0x79   : > { %s317_s11 = scalar_lea.sflag [#allocation3], %s316_s18 }
  0x7a   : > { %p1317_p8 = pneg %p1631_p12 }
  0x7d   : > { %s1625_s9 = scalar_lea.hbm %s2059_s0, %s1108_s24  ;;  %s1320_s26 = scalar_lea.hbm %s2059_s0, 256 }
  0x7e   : > { %s1315_s2 = scalar_lea.hbm %s1625_s9, 128  ;;  %p1321_p1 = scmp.lt.u32.totalorder %s1625_s9, %s2059_s0 }
  0x7f   : > { %p1316_p13 = scmp.ne.s32.totalorder %s1625_s9, %s1315_s2  ;;  %p1322_p3 = scmp.lt.u32.totalorder %s1320_s26, %s1315_s2 }
  0x80   : > { %p1324_p5 = scmp.lt.u32.totalorder %s1315_s2, %s1625_s9 }
  0x81   : > { %p1318_p0 = pnand %p1317_p8, %p1316_p13  ;;  %p1323_p4 = por %p1322_p3, %p1321_p1 }
  0x83   : > { %p1319_p2 = pneg %p1318_p0  ;;  %p1325_p7 = por %p1324_p5, %p1323_p4 }
  0x85   : > { %p1326_p9 = pnand %p1325_p7, %p1319_p2 }
  0x87   : > { %1329 = shalt.err (!%p1326_p9)
}
  0x88   : > { %s1330_s18 = scalar_lea.vmem %s1627_s25, 128  ;;  %s1435_s10 = smov [#allocation2]  }
  0x89   : > { %p1331_p13 = scmp.ne.s32.totalorder %s1627_s25, %s1330_s18  ;;  %s1335_s22 = sshll.u32 %s1435_s10, 4  ;;  %s1336_s22 = int_to_ptr.vmem [resolvable:$false] %s1335_s22 }
  0x8a   : > { %s1337_s24 = scalar_lea.vmem %s1336_s22, 256  ;;  %p1338_p10 = scmp.lt.s32.totalorder %s1627_s25, %s1336_s22 }
  0x8b   : > { %p1333_p0 = pnand %p1331_p13, %p1317_p8  ;;  %p1339_p1 = scmp.lt.s32.totalorder %s1337_s24, %s1330_s18 }
  0x8d   : > { %p1334_p11 = pneg %p1333_p0  ;;  %p1340_p3 = por %p1339_p1, %p1338_p10 }
  0x8f   : > { %p1341_p4 = pnand %p1340_p3, %p1334_p11 }
  0x91   : > { %1344 = shalt.err (!%p1341_p4)
}
  0x92   : > { %1161 = dma.hbm_to_vmem [thread:$0]  (!%p1631_p12), %s1625_s9, 128, %s1627_s25, %s317_s11  }
  0x93   : > { %p2061_p2 = scmp.ne.s32.totalorder %s2042_s13, 0 }
  0x95   : > { %345 = sbr.rel (%p2061_p2) target bundleno = 523 (0x20b), region = 52 }
  0x9c   : > { %s1663_s2 = sand.u32 1, %s1419_s28  }
  0x9d   : > { %2062 = sst [smem:[#allocation31_spill]] %s1663_s2  ;;  %s2010_s26 = sshll.u32 %s1663_s2, 3 }
  0x9e   : > { %s348_s16 = scalar_lea.sflag [#allocation3], %s1663_s2  ;;  %s351_s23 = scalar_lea.vmem [#allocation2], %s2010_s26 }
  0x9f   : > { %1390 = dma.done.wait (%p1606_p6), %s348_s16, 128  }
  0xa0   : > { %1392 = vsyncadd (%p1606_p6), %s348_s16, 4294967168  ;;  %p2063_p10 = scmp.eq.s32.totalorder %s1508_s12, 0 }
  0xa2   : > { %1394 = dma.done.wait (%p2063_p10), [#allocation5], 64   ;;  %p2064_p11 = pmov %p2063_p10 }
  0xa3   : > { %p2065_p12 = pmov %p2063_p10 }
  0xa4   : > { %1396 = vsyncadd (%p2064_p11), [#allocation5], 4294967232 }
  0xa5   : > { %1398 = dma.done.wait (%p2065_p12), [#allocation8], 128   ;;  %p2066_p8 = pmov %p2063_p10 }
  0xa7   : > { %1400 = vsyncadd (%p2066_p8), [#allocation8], 4294967168  ;;  %p2067_p5 = pmov %p2066_p8 }
  0xa9   : > { %1402 = dma.done.wait (%p2067_p5), [#allocation11], 128   ;;  %p2068_p7 = pmov %p2067_p5 }
  0xaa   : > { %p2069_p6 = pmov %p2067_p5 }
  0xab   : > { %1404 = vsyncadd (%p2068_p7), [#allocation11], 4294967168 }
  0xac   : > { %1406 = dma.done.wait (%p2069_p6), [#allocation14], 64   ;;  %p2070_p9 = pmov %p2067_p5 }
  0xae   : > { %1408 = vsyncadd (%p2070_p9), [#allocation14], 4294967232 }
  0xaf   : > { %380 = sfence }
  0xb0   : > { %v1689_v0 = vld [vmem:[%s351_s23] sm:$0xff]  ;;  %vm423_vm0 = vcmask 1043456   ;;  %p414_p13 = scmp.lt.s32.totalorder %s1508_s12, 1  ;;  %s1043_s13 = sld [smem:[#allocation6 + $0x80]]  ;;  %v434_v4 = vlaneseq  ;;  %vm505_vm1 = vcmask 1040384   ;;  %vm814_vm2 = vcmask 1041408  }
  0xb1   : > { %v421_v1 = vcombine.high %v1689_v0, %v1689_v0  ;;  %v424_v2 = vsel %vm423_vm0, %v1689_v0, 0.0  ;;  %s1044_s17 = sld [smem:[#allocation6 + $0x81]]  ;;  %s1046_s9 = sld [smem:[#allocation6 + $0x82]]  ;;  %vm816_vm3 = vcmask 1042432  }
  0xb2   : > { %s415_s25 = scalar_select %p414_p13, %s1508_s12, 1  ;;  %v1707_v8 = vshrl.u32 %v434_v4, 7 }
  0xb3   : > { %v425_v3 = vsel %vm423_vm0, %v421_v1, 0.0  ;;  %s1048_s20 = sld [smem:[#allocation6 + $0x83]]  ;;  %s1698_s11 = sld [smem:[#allocation7 + $0x80]] }
  0xb4   : > { %v426_v5 = vadd.f32 %v425_v3, %v424_v2  ;;  %s1109_s18 = sshll.u32 %s415_s25, 3  ;;  %s463_s10 = sld [smem:[#allocation6]]  ;;  %v1726_v19 = vsub.s32 0, %v1707_v8  ;;  %v501_v42 = vsub.s32 4, %v1707_v8 }
  0xb5   : > { %s2071_s1 = sld [smem:[#allocation39_spill]]  ;;  %s1037_s23 = sld [smem:[#allocation6 + $0x1]] }
  0xb6   : > { %427 = vadd.xlane.f32.xlu0 %v426_v5  ;;  %v513_v7 = vstv %s1043_s13  ;;  %s1039_s26 = sld [smem:[#allocation6 + $0x2]]  ;;  %s1705_s0 = sld [smem:[#allocation6 + $0x3]] }
  0xb7   : > { %v516_v9 = vstv %s1044_s17  ;;  %v524_v10 = vstv %s1046_s9  ;;  %s1709_s3 = sld [smem:[#allocation6 + $0x100]]  ;;  %s1714_s25 = sld [smem:[#allocation6 + $0x101]] }
  0xb8   : > { %s1718_s13 = sld [smem:[#allocation7]]  ;;  %s1720_s22 = sld [smem:[#allocation6 + $0x103]] }
  0xb9   : > { %v532_v14 = vstv %s1048_s20  ;;  %s1723_s17 = sld [smem:[#allocation6 + $0x180]]  ;;  %s1729_s9 = sld [smem:[#allocation6 + $0x181]]  ;;  %v540_v26 = vstv %s1698_s11 }
  0xba   : > { %v464_v18 = vstv %s463_s10  ;;  %s1731_s20 = sld [smem:[#allocation6 + $0x182]]  ;;  %s1738_s10 = sld [smem:[#allocation6 + $0x183]] }
  0xbb   : > { %s418_s16 = scalar_lea.vmem %s2071_s1, %s1109_s18  ;;  %s1716_s18 = sld [smem:[#allocation6 + $0x102]]  ;;  %v467_v21 = vstv %s1037_s23 }
  0xbc   : > { %v1703_v6 = vld [vmem:[%s418_s16] sm:$0xff]  ;;  %v475_v25 = vstv %s1039_s26  ;;  %v483_v28 = vstv %s1705_s0  ;;  %s1745_s26 = sld [smem:[#allocation7 + $0x100]]  ;;  %s1781_s11 = sld [smem:[#allocation12 + $0x81]] }
  0xbd   : > { %v514_v11 = vmul.f32 %v513_v7, %v1703_v6  ;;  %v517_v12 = vmul.f32 %v516_v9, %v1703_v6  ;;  %v525_v13 = vmul.f32 %v524_v10, %v1703_v6  ;;  %v533_v17 = vmul.f32 %v532_v14, %v1703_v6  ;;  %s1756_s0 = sld [smem:[#allocation7 + $0x180]]  ;;  %s1787_s23 = sld [smem:[#allocation12 + $0x101]] }
  0xbe   : > { %v465_v20 = vmul.f32 %v464_v18, %v1703_v6  ;;  %v468_v24 = vmul.f32 %v467_v21, %v1703_v6  ;;  %v476_v27 = vmul.f32 %v475_v25, %v1703_v6  ;;  %v561_v29 = vstv %s1709_s3  ;;  %s1779_s3 = sld [smem:[#allocation12 + $0x80]]  ;;  %s1817_s4 = sld [smem:[#allocation12 + $0x183]] }
  0xbf   : > { %v1045_v15 = vrot.slane %v517_v12, 9  ;;  %v1047_v16 = vrot.slane %v525_v13, 10  ;;  %v1049_v23 = vrot.slane %v533_v17, 11  ;;  %v484_v32 = vmul.f32 %v483_v28, %v1703_v6  ;;  %s1783_s24 = sld [smem:[#allocation12 + $0x100]]  ;;  %s1825_s15 = sld [smem:[#allocation9 + $0x1]] }
  0xc0   : > { %v1038_v31 = vrot.slane %v468_v24, 9  ;;  %v562_v33 = vmul.f32 %v561_v29, %v1703_v6  ;;  %v1040_v34 = vrot.slane %v476_v27, 10  ;;  %v564_v35 = vstv %s1714_s25  ;;  %s1785_s16 = sld [smem:[#allocation12]]  ;;  %s1789_s25 = sld [smem:[#allocation12 + $0x1]] }
  0xc1   : > { %v522_v22 = vadd.f32 %v1045_v15, %v514_v11  ;;  %v572_v36 = vstv %s1716_s18  ;;  %v580_v37 = vstv %s1720_s22  ;;  %v1042_v40 = vrot.slane %v484_v32, 11  ;;  %s1791_s18 = sld [smem:[#allocation12 + $0x82]]  ;;  %s1815_s1 = sld [smem:[#allocation13 + $0x80]] }
  0xc2   : > { %v473_v39 = vadd.f32 %v1038_v31, %v465_v20  ;;  %v565_v41 = vmul.f32 %v564_v35, %v1703_v6  ;;  %v491_v43 = vstv %s1718_s13  ;;  %v573_v44 = vmul.f32 %v572_v36, %v1703_v6  ;;  %s1794_s13 = sld [smem:[#allocation12 + $0x2]]  ;;  %s1819_s5 = sld [smem:[#allocation13 + $0x100]] }
  0xc3   : > { %v530_v30 = vadd.f32 %v1047_v16, %v522_v22  ;;  %v581_v45 = vmul.f32 %v580_v37, %v1703_v6  ;;  %v609_v49 = vstv %s1723_s17  ;;  %v612_v52 = vstv %s1729_s9  ;;  %s1796_s22 = sld [smem:[#allocation12 + $0x102]]  ;;  %s1798_s17 = sld [smem:[#allocation12 + $0x83]] }
  0xc4   : > { %v481_v47 = vadd.f32 %v1040_v34, %v473_v39  ;;  %v1053_v48 = vrot.slane %v565_v41, 9  ;;  %v1055_v50 = vrot.slane %v573_v44, 10  ;;  %v620_v53 = vstv %s1731_s20  ;;  %s1800_s9 = sld [smem:[#allocation12 + $0x103]]  ;;  %s1821_s6 = sld [smem:[#allocation9]] }
  0xc5   : > { %v538_v38 = vadd.f32 %v1049_v23, %v530_v30  ;;  %v1057_v51 = vrot.slane %v581_v45, 11  ;;  %v613_v57 = vmul.f32 %v612_v52, %v1703_v6  ;;  %v610_v58 = vmul.f32 %v609_v49, %v1703_v6  ;;  %s1805_s20 = sld [smem:[#allocation12 + $0x3]]  ;;  %s1823_s7 = sld [smem:[#allocation13]] }
  0xc6   : > { %v489_v55 = vadd.f32 %v1042_v40, %v481_v47  ;;  %v570_v56 = vadd.f32 %v1053_v48, %v562_v33  ;;  %v621_v59 = vmul.f32 %v620_v53, %v1703_v6  ;;  %v628_v60 = vstv %s1738_s10  ;;  %s1807_s10 = sld [smem:[#allocation12 + $0x180]]  ;;  %s1829_s28 = sld [smem:[#allocation9 + $0x2]] }
  0xc7   : > { %v541_v46 = vadd.f32 %v540_v26, %v538_v38  ;;  %v588_v2 = vstv %s1745_s26  ;;  %v1061_v3 = vrot.slane %v613_v57, 9  ;;  %v629_v5 = vmul.f32 %v628_v60, %v1703_v6  ;;  %2072 = sst [smem:[#allocation32_spill]] %s1791_s18  ;;  %s1809_s26 = sld [smem:[#allocation12 + $0x181]] }
  0xc8   : > { %v492_v63 = vadd.f32 %v491_v43, %v489_v55  ;;  %v578_v1 = vadd.f32 %v1055_v50, %v570_v56  ;;  %v1063_v4 = vrot.slane %v621_v59, 10  ;;  %v636_v22 = vstv %s1756_s0  ;;  %s1811_s0 = sld [smem:[#allocation12 + $0x182]]  ;;  %s1827_s29 = sld [smem:[#allocation13 + $0x180]] }
  0xc9   : > { %v542_v54 = vmax.f32 %v541_v46, 0.0  ;;  %v618_v13 = vadd.f32 %v1061_v3, %v610_v58  ;;  %v1065_v14 = vrot.slane %v629_v5, 11  ;;  %v1436_v37 = vmov 0   ;;  %2073 = sst [smem:[#allocation33_spill]] %s1798_s17  ;;  %s1835_s30 = sld [smem:[#allocation10]] }
  0xca   : > { %v493_v10 = vmax.f32 %v492_v63, 0.0  ;;  %v586_v11 = vadd.f32 %v1057_v51, %v578_v1  ;;  %1221 = vset.pattern.permute.xlu1 %v1436_v37  ;;  %1220 = vset.pattern.permute.xlu0 %v1436_v37  ;;  %v1437_v38 = vmov 839922192   ;;  %s1833_s14 = sld [smem:[#allocation9 + $0x3]]  ;;  %s1837_s21 = sld [smem:[#allocation9 + $0x80]]  ;;  %v697_v48 = vstv %s1779_s3 }
  0xcb   : > { %v547_v61 = vrot.slane %v542_v54, %v1726_v19  ;;  %v551_v62 = vrot.slane %v542_v54, %v501_v42  ;;  %v626_v18 = vadd.f32 %v1063_v4, %v618_v13  ;;  %v432_v39 = vunpack.c.l.s4 %v1437_v38  ;;  %s1839_s27 = sld [smem:[#allocation10 + $0x80]]  ;;  %s1841_s8 = sld [smem:[#allocation9 + $0x81]] }
  0xcc   : > { %v498_v15 = vrot.slane %v493_v10, %v1726_v19  ;;  %v502_v16 = vrot.slane %v493_v10, %v501_v42  ;;  %v589_v17 = vadd.f32 %v588_v2, %v586_v11  ;;  %s1843_s19 = sld [smem:[#allocation10 + $0x100]]  ;;  %s1845_s2 = sld [smem:[#allocation9 + $0x82]]  ;;  %v704_v49 = vstv %s1781_s11 }
  0xcd   : > { %v554_v7 = vsel %vm505_vm1, %v547_v61, 0.0  ;;  %v555_v9 = vsel %vm505_vm1, %v551_v62, 0.0  ;;  %v634_v24 = vadd.f32 %v1065_v14, %v626_v18  ;;  %v433_v40 = vunpack.c.0.s8 %v432_v39  ;;  %s1847_s12 = sld [smem:[#allocation9 + $0x83]]  ;;  %s1866_s11 = sld [smem:[#allocation9 + $0x180]] }
  0xce   : > { %v556_v12 = vadd.f32 %v555_v9, %v554_v7  ;;  %v506_v20 = vsel %vm505_vm1, %v498_v15, 0.0  ;;  %v507_v6 = vsel %vm505_vm1, %v502_v16, 0.0  ;;  %v590_v21 = vmax.f32 %v589_v17, 0.0  ;;  %s1864_s3 = sld [smem:[#allocation9 + $0x103]] }
  0xcf   : > { %v508_v23 = vadd.f32 %v507_v6, %v506_v20  ;;  %v637_v27 = vadd.f32 %v636_v22, %v634_v24  ;;  %v1777_v41 = vsub.s32 %v433_v40, %v1707_v8  ;;  %v734_v50 = vstv %s1783_s24 }
  0xd0   : > { %557 = vadd.xlane.f32.xlu1 %v556_v12  ;;  %v595_v25 = vrot.slane %v590_v21, %v1726_v19  ;;  %v599_v26 = vrot.slane %v590_v21, %v501_v42  ;;  %2074 = sst [smem:[#allocation34_spill]] %s1833_s14  ;;  %s1849_s14 = sld [smem:[#allocation9 + $0x100]]  ;;  %v660_v51 = vstv %s1785_s16  ;;  %v667_v52 = vstv %s1789_s25 }
  0xd1   : > { %509 = vadd.xlane.f32.xlu0 %v508_v23  ;;  %v638_v31 = vmax.f32 %v637_v27, 0.0  ;;  %2075 = sst [smem:[#allocation35_spill]] %s1837_s21  ;;  %s1851_s21 = sld [smem:[#allocation9 + $0x101]]  ;;  %v712_v53 = vstv %s1791_s18  ;;  %v741_v54 = vstv %s1787_s23  ;;  %v675_v55 = vstv %s1794_s13 }
  0xd2   : > { %v602_v28 = vsel %vm505_vm1, %v595_v25, 0.0  ;;  %v603_v29 = vsel %vm505_vm1, %v599_v26, 0.0  ;;  %2076 = sst [smem:[#allocation36_spill]] %s1841_s8  ;;  %s1856_s8 = sld [smem:[#allocation9 + $0x102]]  ;;  %v720_v56 = vstv %s1798_s17  ;;  %v749_v57 = vstv %s1796_s22 }
  0xd3   : > { %v604_v30 = vadd.f32 %v603_v29, %v602_v28  ;;  %v643_v32 = vrot.slane %v638_v31, %v1726_v19  ;;  %v647_v33 = vrot.slane %v638_v31, %v501_v42  ;;  %2077 = sst [smem:[#allocation37_spill]] %s1845_s2  ;;  %s1858_s2 = sld [smem:[#allocation9 + $0x181]]  ;;  %v757_v58 = vstv %s1800_s9 }
  0xd4   : > { %v683_v59 = vstv %s1805_s20  ;;  %v771_v60 = vstv %s1807_s10  ;;  %s2078_s24 = sld [smem:[#allocation34_spill]]  ;;  %v778_v61 = vstv %s1809_s26  ;;  %s2079_s16 = sld [smem:[#allocation35_spill]]  ;;  %v786_v62 = vstv %s1811_s0 }
  0xd5   : > { %605 = vadd.xlane.f32.xlu1 %v604_v30  ;;  %v650_v34 = vsel %vm505_vm1, %v643_v32, 0.0  ;;  %v651_v35 = vsel %vm505_vm1, %v647_v33, 0.0  ;;  %s2080_s23 = sld [smem:[#allocation36_spill]]  ;;  %s687_s25 = sadd.f32 1.0, %s1835_s30  ;;  %v728_v63 = vstv %s1815_s1  ;;  %v765_v1 = vstv %s1819_s5 }
  0xd6   : > { %v652_v36 = vadd.f32 %v651_v35, %v650_v34  ;;  %s2081_s18 = sld [smem:[#allocation37_spill]]  ;;  %v794_v2 = vstv %s1817_s4  ;;  %v657_v3 = vstv %s1821_s6  ;;  %s724_s17 = sadd.f32 1.0, %s1839_s27  ;;  %v691_v5 = vstv %s1823_s7 }
  0xd7   : > { %v802_v7 = vstv %s1827_s29  ;;  %v663_v9 = vstv %s1825_s15  ;;  %v671_v10 = vstv %s1829_s28  ;;  %s761_s10 = sadd.f32 1.0, %s1843_s19  ;;  %s1890_s30 = sld [smem:[#allocation10 + $0x180]]  ;;  %v1892_v15 = vstv %s687_s25 }
  0xd8   : > { %653 = vadd.xlane.f32.xlu0 %v652_v36  ;;  %v716_v17 = vstv %s1847_s12  ;;  %v731_v18 = vstv %s1849_s14  ;;  %v1897_v20 = vstv %s724_s17  ;;  %v737_v6 = vstv %s1851_s21  ;;  %s1906_s6 = sld [smem:[#allocation9 + $0x182]]  ;;  %s1908_s27 = sld [smem:[#allocation9 + $0x183]] }
  0xd9   : > { %v745_v21 = vstv %s1856_s8  ;;  %v774_v22 = vstv %s1858_s2  ;;  %v753_v25 = vstv %s1864_s3  ;;  %v1903_v26 = vstv %s761_s10  ;;  %s2084_s1 = sld [smem:[#allocation26_spill]]  ;;  %s2085_s4 = sld [smem:[#allocation31_spill]] }
  0xda   : > { %v679_v12 = vstv %s2078_s24  ;;  %v694_v13 = vstv %s2079_s16  ;;  %v768_v27 = vstv %s1866_s11  ;;  %s2086_s5 = sld [smem:[#allocation29_spill]]  ;;  %s1438_s17 = smov [#allocation15]  }
  0xdb   : > { %v700_v14 = vstv %s2080_s23  ;;  %s2088_s2 = sld [smem:[#allocation46_spill]]  ;;  %s1349_s9 = sshll.u32 %s1438_s17, 4  ;;  %s1350_s9 = int_to_ptr.vmem [resolvable:$false] %s1349_s9 }
  0xdc   : > { %v708_v16 = vstv %s2081_s18  ;;  %s1351_s20 = scalar_lea.vmem %s1350_s9, 256 }
  0xdd   : > { %s798_s28 = sadd.f32 1.0, %s1890_s30 }
  0xdf   : > { %s1110_s7 = sshll.u32 %s2084_s1, 7  ;;  %s2087_s29 = sshll.u32 %s2085_s4, 3 }
  0xe0   : > { %s413_s12 = scalar_lea.vmem [#allocation15], %s2087_s29  ;;  %s858_s13 = scalar_lea.sflag [#allocation4], %s2085_s4 }
  0xe1   : > { %s872_s15 = sshll.u32 %s413_s12, 4  ;;  %s1954_s18 = scalar_lea.hbm %s2088_s2, %s1110_s7  ;;  %s1956_s15 = int_to_ptr.vmem [resolvable:$true] %s872_s15 }
  0xe2   : > { %s1345_s22 = scalar_lea.vmem %s1956_s15, 128  ;;  %p2089_p1 = scmp.ne.s32.totalorder %s2086_s5, 0 }
  0xe3   : > { %p1346_p0 = scmp.ne.s32.totalorder %s1956_s15, %s1345_s22  ;;  %p1352_p2 = scmp.lt.s32.totalorder %s1956_s15, %s1350_s9 }
  0xe4   : > { %p1353_p10 = scmp.lt.s32.totalorder %s1351_s20, %s1345_s22 }
  0xe5   : > { %p1347_p3 = pnand %p1346_p0, %p2089_p1 }
  0xe6   : > { %p1354_p11 = por %p1353_p10, %p1352_p2 }
  0xe7   : > { %p1348_p4 = pneg %p1347_p3 }
  0xe9   : > { %p1355_p12 = pnand %p1354_p11, %p1348_p4 }
 0x143   : > { %v428_v43 = vpop.xlane.xlu0 %427 }
 0x144   : > { %v429_v19 = vmul.f32 0.00390625, %v428_v43 }
 0x146   : > { %v437_v42 = vrot.slane %v429_v19, %v1777_v41 }
 0x148   : > { %v1803_v8 = vsub.f32 %v1689_v0, %v437_v42 }
 0x14a   : > { %v440_v44 = vmul.f32 %v1803_v8, %v1803_v8 }
 0x14c   : > { %v442_v0 = vcombine.high %v440_v44, %v440_v44  ;;  %v444_v45 = vsel %vm423_vm0, %v440_v44, 0.0 }
 0x14e   : > { %v445_v46 = vsel %vm423_vm0, %v442_v0, 0.0 }
 0x14f   : > { %v446_v47 = vadd.f32 %v445_v46, %v444_v45 }
 0x151   : > { %447 = vadd.xlane.f32.xlu1 %v446_v47 }
 0x15d   : > { %v558_v4 = vpop.xlane.xlu1 %557 }
 0x15e   : > { %v559_v11 = vmul.f32 0.00390625, %v558_v4  ;;  %v510_v23 = vpop.xlane.xlu0 %509 }
 0x15f   : > { %v511_v28 = vmul.f32 0.00390625, %v510_v23 }
 0x160   : > { %v668_v24 = vmul.f32 %v667_v52, %v559_v11  ;;  %v705_v29 = vmul.f32 %v704_v49, %v559_v11  ;;  %v742_v30 = vmul.f32 %v741_v54, %v559_v11  ;;  %v779_v31 = vmul.f32 %v778_v61, %v559_v11 }
 0x161   : > { %v664_v32 = vmul.f32 %v663_v9, %v559_v11  ;;  %v701_v33 = vmul.f32 %v700_v14, %v559_v11  ;;  %v738_v34 = vmul.f32 %v737_v6, %v559_v11  ;;  %v775_v35 = vmul.f32 %v774_v22, %v559_v11 }
 0x162   : > { %v661_v36 = vmul.f32 %v660_v51, %v511_v28  ;;  %v698_v37 = vmul.f32 %v697_v48, %v511_v28  ;;  %v735_v38 = vmul.f32 %v734_v50, %v511_v28  ;;  %v772_v39 = vmul.f32 %v771_v60, %v511_v28  ;;  %v606_v40 = vpop.xlane.xlu1 %605 }
 0x163   : > { %v658_v43 = vmul.f32 %v657_v3, %v511_v28  ;;  %v695_v19 = vmul.f32 %v694_v13, %v511_v28  ;;  %v732_v42 = vmul.f32 %v731_v18, %v511_v28  ;;  %v769_v44 = vmul.f32 %v768_v27, %v511_v28 }
 0x164   : > { %v607_v0 = vmul.f32 0.00390625, %v606_v40  ;;  %v669_v45 = vadd.f32 %v668_v24, %v661_v36  ;;  %v706_v46 = vadd.f32 %v705_v29, %v698_v37  ;;  %v743_v47 = vadd.f32 %v742_v30, %v735_v38 }
 0x165   : > { %v780_v49 = vadd.f32 %v779_v31, %v772_v39  ;;  %v665_v51 = vadd.f32 %v664_v32, %v658_v43  ;;  %v702_v48 = vadd.f32 %v701_v33, %v695_v19  ;;  %v739_v50 = vadd.f32 %v738_v34, %v732_v42  ;;  %v654_v13 = vpop.xlane.xlu0 %653 }
 0x166   : > { %v676_v52 = vmul.f32 %v675_v55, %v607_v0  ;;  %v713_v54 = vmul.f32 %v712_v53, %v607_v0  ;;  %v750_v60 = vmul.f32 %v749_v57, %v607_v0  ;;  %v787_v61 = vmul.f32 %v786_v62, %v607_v0 }
 0x167   : > { %v672_v3 = vmul.f32 %v671_v10, %v607_v0  ;;  %v709_v4 = vmul.f32 %v708_v16, %v607_v0  ;;  %v746_v9 = vmul.f32 %v745_v21, %v607_v0  ;;  %v782_v11 = vstv %s1906_s6 }
 0x168   : > { %v677_v14 = vadd.f32 %v676_v52, %v669_v45  ;;  %v776_v18 = vadd.f32 %v775_v35, %v769_v44  ;;  %v790_v6 = vstv %s1908_s27  ;;  %v799_v55 = vstv %s798_s28 }
 0x169   : > { %v655_v22 = vmul.f32 0.00390625, %v654_v13  ;;  %v714_v53 = vadd.f32 %v713_v54, %v706_v46  ;;  %v751_v23 = vadd.f32 %v750_v60, %v743_v47  ;;  %v788_v57 = vadd.f32 %v787_v61, %v780_v49 }
 0x16a   : > { %v673_v62 = vadd.f32 %v672_v3, %v665_v51  ;;  %v710_v10 = vadd.f32 %v709_v4, %v702_v48  ;;  %v747_v16 = vadd.f32 %v746_v9, %v739_v50  ;;  %v783_v24 = vmul.f32 %v782_v11, %v607_v0 }
 0x16b   : > { %v684_v21 = vmul.f32 %v683_v59, %v655_v22  ;;  %v721_v27 = vmul.f32 %v720_v56, %v655_v22  ;;  %v758_v28 = vmul.f32 %v757_v58, %v655_v22  ;;  %v795_v29 = vmul.f32 %v794_v2, %v655_v22 }
 0x16c   : > { %v680_v30 = vmul.f32 %v679_v12, %v655_v22  ;;  %v717_v31 = vmul.f32 %v716_v17, %v655_v22  ;;  %v754_v32 = vmul.f32 %v753_v25, %v655_v22  ;;  %v784_v33 = vadd.f32 %v783_v24, %v776_v18 }
 0x16d   : > { %v685_v34 = vadd.f32 %v684_v21, %v677_v14  ;;  %v722_v35 = vadd.f32 %v721_v27, %v714_v53  ;;  %v759_v36 = vadd.f32 %v758_v28, %v751_v23  ;;  %v796_v59 = vadd.f32 %v795_v29, %v788_v57 }
 0x16e   : > { %v681_v37 = vadd.f32 %v680_v30, %v673_v62  ;;  %v718_v38 = vadd.f32 %v717_v31, %v710_v10  ;;  %v755_v56 = vadd.f32 %v754_v32, %v747_v16  ;;  %v791_v39 = vmul.f32 %v790_v6, %v655_v22 }
 0x16f   : > { %v692_v58 = vadd.f32 %v691_v5, %v685_v34  ;;  %v729_v40 = vadd.f32 %v728_v63, %v722_v35  ;;  %v766_v2 = vadd.f32 %v765_v1, %v759_v36  ;;  %v803_v12 = vadd.f32 %v802_v7, %v796_v59 }
 0x170   : > { %v689_v17 = vadd.f32 %v1892_v15, %v681_v37  ;;  %v726_v25 = vadd.f32 %v1897_v20, %v718_v38  ;;  %v763_v43 = vadd.f32 %v1903_v26, %v755_v56  ;;  %v792_v19 = vadd.f32 %v791_v39, %v784_v33 }
 0x171   : > { %v819_v42 = vrot.slane %v729_v40, 7  ;;  %v822_v44 = vrot.slane %v766_v2, 6  ;;  %v825_v0 = vrot.slane %v803_v12, 5 }
 0x172   : > { %v800_v45 = vadd.f32 %v799_v55, %v792_v19  ;;  %v805_v5 = vrot.slane %v726_v25, 7  ;;  %v808_v46 = vrot.slane %v763_v43, 6 }
 0x173   : > { %v827_v63 = vsel %vm505_vm1, %v692_v58, %v819_v42 }
 0x174   : > { %v828_v1 = vsel %vm814_vm2, %v827_v63, %v822_v44  ;;  %v811_v47 = vrot.slane %v800_v45, 5  ;;  %v813_v7 = vsel %vm505_vm1, %v689_v17, %v805_v5 }
 0x175   : > { %v829_v15 = vsel %vm816_vm3, %v828_v1, %v825_v0  ;;  %v815_v20 = vsel %vm814_vm2, %v813_v7, %v808_v46 }
 0x176   : > { %845 = vperm.xlu1 %1221, %v829_v15   ;;  %v817_v26 = vsel %vm816_vm3, %v815_v20, %v811_v47 }
 0x177   : > { %832 = vperm.xlu0 %1220, %v817_v26  }
 0x1de   : > { %v448_v49 = vpop.xlane.xlu1 %447 }
 0x1df   : > { %v449_v51 = vmul.f32 0.00390625, %v448_v49 }
 0x1e1   : > { %v450_v48 = vadd.f32 1e-05, %v449_v51 }
 0x1e3   : > { %1223 = vrsqrt.f32 %v450_v48 }
 0x1ed   : > { %v1224_v50 = vpop.eup %1223 }
 0x1ee   : > { %v459_v52 = vrot.slane %v1224_v50, %v1777_v41 }
 0x1f0   : > { %v461_v54 = vmul.f32 %v459_v52, %v1803_v8 }
 0x1f5   : > { %v846_v60 = vpop.permute.xlu1 %845 }
 0x1f6   : > { %v833_v61 = vpop.permute.xlu0 %832  ;;  %v853_v4 = vrot.slane %v846_v60, %v1777_v41 }
 0x1f7   : > { %v840_v3 = vrot.slane %v833_v61, %v1777_v41 }
 0x1f9   : > { %v842_v9 = vmul.f32 %v840_v3, %v461_v54 }
 0x1fb   : > { %v855_v11 = vadd.f32 %v853_v4, %v842_v9 }
 0x1fd   : > { %856 = vst [vmem:[%s413_s12] sm:$0xff] %v855_v11 }
 0x1fe   : > { %1358 = shalt.err (!%p1355_p12)
}
 0x1ff   : > { %s1359_s26 = scalar_lea.hbm %s1954_s18, 128  ;;  %s1363_s11 = scalar_lea.hbm %s2088_s2, 256 }
 0x200   : > { %p1360_p8 = scmp.ne.s32.totalorder %s1954_s18, %s1359_s26  ;;  %p1364_p6 = scmp.lt.u32.totalorder %s1954_s18, %s2088_s2 }
 0x201   : > { %p1365_p9 = scmp.lt.u32.totalorder %s1363_s11, %s1359_s26  ;;  %p1367_p0 = scmp.lt.u32.totalorder %s1359_s26, %s1954_s18 }
 0x202   : > { %p1361_p5 = pnand %p1360_p8, %p2089_p1 }
 0x203   : > { %p1366_p13 = por %p1365_p9, %p1364_p6 }
 0x204   : > { %p1362_p7 = pneg %p1361_p5 }
 0x205   : > { %p1368_p3 = por %p1367_p0, %p1366_p13 }
 0x207   : > { %p1369_p4 = pnand %p1368_p3, %p1362_p7 }
 0x209   : > { %1372 = shalt.err (!%p1369_p4)
}
 0x20a   : > { %1137 = dma.vmem_to_hbm [thread:$0]  (%p2089_p1), %s1956_s15, 128, %s1954_s18, %s858_s13  }
 0x20b PF: > { %s2090_s23 = sld [smem:[#allocation22_spill]]  ;;  %s2091_s25 = sld [smem:[#allocation30_spill]] }
 0x20c   : > { %s2092_s10 = sld [smem:[#allocation25_spill]] }
 0x211   : > { %s884_s30 = sand.u32 1, %s2090_s23   ;;  %p2093_p2 = scmp.ne.s32.totalorder %s2091_s25, 0 }
 0x212   : > { %p2094_p10 = scmp.ge.s32.totalorder %s2092_s10, 2  ;;  %s885_s6 = scalar_lea.sflag [#allocation4], %s884_s30 }
 0x214   : > { %p1163_p11 = pnand %p2094_p10, %p2093_p2 }
 0x216   : > { %1410 = dma.done.wait (!%p1163_p11), %s885_s6, 128  }
 0x217   : > { %1412 = vsyncadd (!%p1163_p11), %s885_s6, 4294967168  ;;  %s2095_s30 = sld [smem:[#allocation27_spill]]  ;;  %s2096_s27 = sld [smem:[#allocation23_spill]] }
 0x218   : > { %s2097_s28 = sld [smem:[#allocation24_spill]]  ;;  %s2098_s29 = sld [smem:[#allocation28_spill]] }
 0x21d   : > { %p25_p12 = scmp.ge.s32.totalorder %s2095_s30, 4  }
 0x21f   :  { %27 = sbr.rel (!%p25_p12) target bundleno = 19 (0x13), region = 125 }
 0x226   :  { %890 = vsyncpa [#allocation3], 1 }
 0x227   :  { %892 = vsyncpa [#allocation3 + $0x1], 1 }
 0x228   :  { %893 = vsyncpa [#allocation4], 1 }
 0x229   :  { %895 = vsyncpa [#allocation4 + $0x1], 1 }
 0x22a   :  { %896 = vsyncpa [#allocation5], 1 }
 0x22b   :  { %898 = vsyncpa [#allocation5 + $0x1], 1 }
 0x22c   :  { %899 = vsyncpa [#allocation8], 1 }
 0x22d   :  { %900 = vsyncpa [#allocation11], 1 }
 0x22e   :  { %901 = vsyncpa [#allocation14], 1 }

</bundles_post_ra>
